<compile_context>
chip_gen: v6e
topology: v6e:2x2x1
jax: 0.10.0
libtpu: 0.0.40
codegen_flags: <defaults>
</compile_context>

<pallas_src>
import jax
import jax.numpy as jnp
from jax.experimental import pallas as pl
from jax.experimental.pallas import tpu as pltpu

FOLD = 16  # 16 batch rows x 8 features = 128 lanes (lane-dense I/O)


def mlp_kernel(x_ref, w1_ref, b1_ref, w2_ref, b2_ref, o_ref):
    # fc1 (folded, block-diagonal) : bf16 MXU inputs, f32 accumulation
    h = jnp.dot(x_ref[...], w1_ref[...], preferred_element_type=jnp.float32)
    h = jnp.maximum(h + b1_ref[...], 0.0)                      # bias + ReLU in f32
    # fc2 (folded) : cast activations to bf16 for the MXU, accumulate f32
    y = jnp.dot(h.astype(jnp.bfloat16), w2_ref[...],
                preferred_element_type=jnp.float32)
    o_ref[...] = jnp.tanh(y + b2_ref[...]).astype(o_ref.dtype)  # bias + tanh in f32


def _block_diag(w, fold):
    """(k, n) -> (fold*k, fold*n) block-diagonal with `fold` copies of w."""
    k, n = w.shape
    eye = jnp.eye(fold, dtype=w.dtype)
    return (eye[:, None, :, None] * w[None, :, None, :]).reshape(fold * k, fold * n)


def simple_net_forward(x, w1, b1, w2, b2, *, tile_b=32768):
    B, in_dim = x.shape
    hidden = w1.shape[1]
    out_dim = w2.shape[1]
    assert in_dim * FOLD == 128 and out_dim * FOLD == 128, "fold assumes 8-wide features"

    lane_b = FOLD * 8  # 128-row granularity -> folded blocks are (mult of 8, 128)
    b_ceil = ((B + lane_b - 1) // lane_b) * lane_b
    tile_eff = min(((tile_b + lane_b - 1) // lane_b) * lane_b, b_ceil)
    b_pad = ((B + tile_eff - 1) // tile_eff) * tile_eff
    tile_rows = tile_eff // FOLD
    grid = (b_pad // tile_eff,)

    # Pad tail rows, cast to bf16 for HBM<->VMEM + MXU, fold to lane-dense (b_pad/16, 128).
    x_f = jnp.pad(x, ((0, b_pad - B), (0, 0))).astype(jnp.bfloat16)
    x_f = x_f.reshape(b_pad // FOLD, FOLD * in_dim)

    w1_f = _block_diag(w1, FOLD).astype(jnp.bfloat16)                        # (128, 1024)
    w2_f = _block_diag(w2, FOLD).astype(jnp.bfloat16)                        # (1024, 128)
    b1_f = jnp.tile(b1.reshape(1, hidden), (1, FOLD)).astype(jnp.float32)    # (1, 1024)
    b2_f = jnp.tile(b2.reshape(1, out_dim), (1, FOLD)).astype(jnp.float32)   # (1, 128)

    resident = lambda i: (0, 0)  # constant block index -> stays VMEM-resident
    y_f = pl.pallas_call(
        mlp_kernel,
        out_shape=jax.ShapeDtypeStruct((b_pad // FOLD, FOLD * out_dim), jnp.float32),
        grid=grid,
        in_specs=[
            pl.BlockSpec((tile_rows, FOLD * in_dim), lambda i: (i, 0)),      # x (pipelined)
            pl.BlockSpec((FOLD * in_dim, FOLD * hidden), resident),          # W1 folded
            pl.BlockSpec((1, FOLD * hidden), resident),                      # b1 folded
            pl.BlockSpec((FOLD * hidden, FOLD * out_dim), resident),         # W2 folded
            pl.BlockSpec((1, FOLD * out_dim), resident),                     # b2 folded
        ],
        out_specs=pl.BlockSpec((tile_rows, FOLD * out_dim), lambda i: (i, 0)),
        compiler_params=pltpu.CompilerParams(
            dimension_semantics=("parallel",),          # 2x on v7x megacore
            vmem_limit_bytes=32 * 1024 * 1024,          # room for large tiles, safe on all gens
        ),
    )(x_f, w1_f, b1_f, w2_f, b2_f)

    # Lane-dense (b_pad/16, 128) f32 is a pure reshape of (b_pad, 8); drop padded rows.
    return y_f.reshape(b_pad, out_dim)[:B]


def init_params(key, input_dim=8, hidden=64, output_dim=8):
    # nn.Linear-style U(-1/sqrt(fan_in), 1/sqrt(fan_in)); weights stored (in, out).
    k1, k2, k3, k4 = jax.random.split(key, 4)
    bound1 = 1.0 / jnp.sqrt(input_dim)
    bound2 = 1.0 / jnp.sqrt(hidden)
    w1 = jax.random.uniform(k1, (input_dim, hidden), jnp.float32, -bound1, bound1)
    b1 = jax.random.uniform(k2, (1, hidden), jnp.float32, -bound1, bound1)
    w2 = jax.random.uniform(k3, (hidden, output_dim), jnp.float32, -bound2, bound2)
    b2 = jax.random.uniform(k4, (1, output_dim), jnp.float32, -bound2, bound2)
    return w1, b1, w2, b2


if __name__ == "__main__":
    key = jax.random.PRNGKey(0)
    kx, kp = jax.random.split(key)

    B, input_dim, hidden, output_dim = 300, 8, 64, 8   # non-multiple of 128: tests padding
    x = jax.random.normal(kx, (B, input_dim), jnp.float32)
    w1, b1, w2, b2 = init_params(kp, input_dim, hidden, output_dim)

    # Small tile to exercise the multi-step batch grid + tail handling at demo scale.
    out = simple_net_forward(x, w1, b1, w2, b2, tile_b=128)
    jax.block_until_ready(out)
    assert out.shape == (B, output_dim)

    # Reference mirroring kernel numerics (bf16 storage / MXU inputs, f32 accumulation).
    as_bf = lambda a: a.astype(jnp.bfloat16).astype(jnp.float32)
    h_ref = jnp.maximum(as_bf(x) @ as_bf(w1) + b1, 0.0)
    ref_bf = jnp.tanh(as_bf(h_ref) @ as_bf(w2) + b2)
    assert jnp.allclose(out, ref_bf, atol=2e-3), "mismatch vs bf16-matched reference"

    # Pure f32 module semantics, loose tolerance for bf16 I/O.
    ref_f32 = jnp.tanh(jnp.maximum(x @ w1 + b1, 0.0) @ w2 + b2)
    assert jnp.allclose(out, ref_f32, atol=5e-2), "mismatch vs f32 reference"

    print("KERNEL_OK")
</pallas_src>

<mosaic_0001>
module attributes {stable_mosaic.version = 11 : i64} {
  func.func @mlp_kernel(%arg0: i32, %arg1: memref<8x128xbf16, #tpu.memory_space<vmem>>, %arg2: memref<128x1024xbf16, #tpu.memory_space<vmem>>, %arg3: memref<1x1024xf32, #tpu.memory_space<vmem>>, %arg4: memref<1024x128xbf16, #tpu.memory_space<vmem>>, %arg5: memref<1x128xf32, #tpu.memory_space<vmem>>, %arg6: memref<8x128xf32, #tpu.memory_space<vmem>>) attributes {dimension_semantics = [#tpu.dimension_semantics<parallel>], iteration_bounds = array<i64: 3>, scalar_prefetch = 0 : i64, scratch_operands = 0 : i64, tpu.core_type = #tpu.core_type<tc>, window_params = [{transform_indices = @transform_0, window_bounds = array<i64: 8, 128>}, {pipeline_mode = #tpu.pipeline_mode<synchronous>, transform_indices = @transform_1, window_bounds = array<i64: 128, 1024>}, {pipeline_mode = #tpu.pipeline_mode<synchronous>, transform_indices = @transform_2, window_bounds = array<i64: 1, 1024>}, {pipeline_mode = #tpu.pipeline_mode<synchronous>, transform_indices = @transform_3, window_bounds = array<i64: 1024, 128>}, {pipeline_mode = #tpu.pipeline_mode<synchronous>, transform_indices = @transform_4, window_bounds = array<i64: 1, 128>}, {transform_indices = @transform_5, window_bounds = array<i64: 8, 128>}]} {
    %c0 = arith.constant 0 : index
    %c0_0 = arith.constant 0 : index
    %0 = vector.load %arg1[%c0, %c0_0] : memref<8x128xbf16, #tpu.memory_space<vmem>>, vector<8x128xbf16>
    %c0_1 = arith.constant 0 : index
    %c0_2 = arith.constant 0 : index
    %1 = vector.load %arg2[%c0_1, %c0_2] : memref<128x1024xbf16, #tpu.memory_space<vmem>>, vector<128x1024xbf16>
    %cst = arith.constant dense<0.000000e+00> : vector<8x1024xf32>
    %2 = tpu.matmul %0, %1, %cst {dimension_numbers = #tpu.dot_dimension_numbers<[1], [0], [0], [1], [0, 0, 1, 1], [], []>} : vector<8x128xbf16>, vector<128x1024xbf16>, vector<8x1024xf32> -> vector<8x1024xf32>
    %c0_3 = arith.constant 0 : index
    %c0_4 = arith.constant 0 : index
    %3 = vector.load %arg3[%c0_3, %c0_4] : memref<1x1024xf32, #tpu.memory_space<vmem>>, vector<1x1024xf32>
    %4 = vector.broadcast %3 : vector<1x1024xf32> to vector<8x1024xf32>
    %5 = arith.addf %2, %4 : vector<8x1024xf32>
    %cst_5 = arith.constant 0.000000e+00 : f32
    %6 = vector.broadcast %cst_5 : f32 to vector<8x1024xf32>
    %7 = arith.maximumf %5, %6 : vector<8x1024xf32>
    %8 = arith.truncf %7 : vector<8x1024xf32> to vector<8x1024xbf16>
    %c0_6 = arith.constant 0 : index
    %c0_7 = arith.constant 0 : index
    %9 = vector.load %arg4[%c0_6, %c0_7] : memref<1024x128xbf16, #tpu.memory_space<vmem>>, vector<1024x128xbf16>
    %cst_8 = arith.constant dense<0.000000e+00> : vector<8x128xf32>
    %10 = tpu.matmul %8, %9, %cst_8 {dimension_numbers = #tpu.dot_dimension_numbers<[1], [0], [0], [1], [0, 0, 1, 1], [], []>} : vector<8x1024xbf16>, vector<1024x128xbf16>, vector<8x128xf32> -> vector<8x128xf32>
    %c0_9 = arith.constant 0 : index
    %c0_10 = arith.constant 0 : index
    %11 = vector.load %arg5[%c0_9, %c0_10] : memref<1x128xf32, #tpu.memory_space<vmem>>, vector<1x128xf32>
    %12 = vector.broadcast %11 : vector<1x128xf32> to vector<8x128xf32>
    %13 = arith.addf %10, %12 : vector<8x128xf32>
    %14 = math.tanh %13 : vector<8x128xf32>
    %c0_11 = arith.constant 0 : index
    %c0_12 = arith.constant 0 : index
    %15 = vector.load %arg6[%c0_11, %c0_12] : memref<8x128xf32, #tpu.memory_space<vmem>>, vector<8x128xf32>
    tpu.vector_store %arg6[%c0_11, %c0_12], %14 {strides = array<i32>} : memref<8x128xf32, #tpu.memory_space<vmem>>, vector<8x128xf32>,
    return
  }
  func.func @transform_0(%arg0: i32) -> (i32, i32) {
    %c0_i32 = arith.constant 0 : i32
    %c0_i32_0 = arith.constant 0 : i32
    return %arg0, %c0_i32 : i32, i32
  }
  func.func @transform_1(%arg0: i32) -> (i32, i32) {
    %c0_i32 = arith.constant 0 : i32
    %c0_i32_0 = arith.constant 0 : i32
    %c0_i32_1 = arith.constant 0 : i32
    return %c0_i32, %c0_i32_0 : i32, i32
  }
  func.func @transform_2(%arg0: i32) -> (i32, i32) {
    %c0_i32 = arith.constant 0 : i32
    %c0_i32_0 = arith.constant 0 : i32
    %c0_i32_1 = arith.constant 0 : i32
    return %c0_i32, %c0_i32_0 : i32, i32
  }
  func.func @transform_3(%arg0: i32) -> (i32, i32) {
    %c0_i32 = arith.constant 0 : i32
    %c0_i32_0 = arith.constant 0 : i32
    %c0_i32_1 = arith.constant 0 : i32
    return %c0_i32, %c0_i32_0 : i32, i32
  }
  func.func @transform_4(%arg0: i32) -> (i32, i32) {
    %c0_i32 = arith.constant 0 : i32
    %c0_i32_0 = arith.constant 0 : i32
    %c0_i32_1 = arith.constant 0 : i32
    return %c0_i32, %c0_i32_0 : i32, i32
  }
  func.func @transform_5(%arg0: i32) -> (i32, i32) {
    %c0_i32 = arith.constant 0 : i32
    %c0_i32_0 = arith.constant 0 : i32
    return %arg0, %c0_i32 : i32, i32
  }
}

</mosaic_0001>

<bundles_post_ra>
// kernel: tpu_custom_call.1
= control target key start
LH: loop header
LB: loop body
LE: loop exit
PB: predicated region body
PF: predicated region fallthrough
CT: control target
= control target key end

     0   :  { %10 = vsyncpa [#allocation3], 0  ;;  %s2505_s0 = inlined_call_operand.hbm [shape: bf16[24,128], index: 0, kind: input, shape index: {}]   ;;  %s2506_s1 = inlined_call_operand.hbm [shape: bf16[128,1024], index: 1, kind: input, shape index: {}]   ;;  %s2507_s2 = inlined_call_operand.hbm [shape: f32[1,1024], index: 2, kind: input, shape index: {}]   ;;  %s2508_s3 = inlined_call_operand.hbm [shape: bf16[1024,128], index: 3, kind: input, shape index: {}]   ;;  %s2509_s4 = inlined_call_operand.vmem [shape: f32[1,128], index: 4, kind: input, shape index: {}]   ;;  %s2510_s5 = inlined_call_operand.hbm [shape: f32[24,128], index: 5, kind: output, shape index: {}]  }
   0x1   :  { %12 = vsyncpa [#allocation3 + $0x1], 0 }
   0x2   :  { %13 = vsyncpa [#allocation6], 0 }
   0x3   :  { %14 = vsyncpa [#allocation9], 0 }
   0x4   :  { %15 = vsyncpa [#allocation4], 0 }
   0x5   :  { %17 = vsyncpa [#allocation4 + $0x1], 0  ;;  %s2287_s18 = smov 0   ;;  %s2289_s19 = smov 0  }
   0x6   :  { %s2291_s20 = smov 0   ;;  %s2293_s21 = smov 0  }
   0x7 LB: > { %s2308_s22 = sadd.s32 4294967295, %s2245_s21   ;;  %s1684_s23 = sadd.s32 4294967294, %s2245_s21   ;;  %s2245_s21 = sphi %s2293_s21, %s2533_s21   ;;  %s2241_s20 = sphi %s2291_s20, %s2532_s20   ;;  %s2237_s19 = sphi %s2289_s19, %s2531_s19   ;;  %s2233_s18 = sphi %s2287_s18, %s2530_s18  }
   0x8   : > { %p43_p0 = scmp.ne.s32.totalorder %s2237_s19, %s2233_s18  ;;  %p2511_p1 = scmp.eq.s32.totalorder %s2308_s22, 0 }
   0x9   : > { %p157_p3 = scmp.eq.s32.totalorder %s1684_s23, 2  ;;  %p1685_p5 = scmp.ge.s32.totalorder %s2245_s21, 1 }
   0xa   : > { %p2317_p4 = por %p2511_p1, %p43_p0  ;;  %p164_p7 = scmp.lt.s32.totalorder %s2245_s21, 4 }
   0xb   : > { %p2322_p6 = por %p157_p3, %p43_p0  ;;  %s2247_s27 = smov [#allocation5]  }
   0xc   : > { %s2515_s24 = scalar_select %p2317_p4, 1, 0 }
   0xd   : > { %s2516_s25 = scalar_select %p2322_p6, 1, 0 }
   0xe   : > { %p2327_p8 = pnand %p1685_p5, %p164_p7  ;;  %s176_s28 = sshll.u32 %s2247_s27, 4  ;;  %s177_s28 = int_to_ptr.vmem [resolvable:$true] %s176_s28 }
   0xf   : > { %s2248_s30 = smov [#allocation7]   ;;  %s2249_s7 = smov [#allocation8]  }
  0x10   : > { %s2517_s26 = scalar_select %p2327_p8, 1, 0 }
  0x11   : > { %p1935_p9 = pneg %p2327_p8  ;;  %s190_s6 = sshll.u32 %s2248_s30, 4  ;;  %s191_s6 = int_to_ptr.vmem [resolvable:$true] %s190_s6 }
  0x12   : > { %s200_s8 = sshll.u32 %s2249_s7, 4  ;;  %s2078_s9 = scalar_lea.vmem %s177_s28, 8192  ;;  %s201_s8 = int_to_ptr.vmem [resolvable:$true] %s200_s8 }
  0x13   : > { %p2335_p10 = pnand %p1935_p9, %p2511_p1  ;;  %p2079_p12 = scmp.ne.s32.totalorder %s177_s28, %s2078_s9 }
  0x14   : > { %p2086_p3 = scmp.lt.s32.totalorder %s177_s28, %s177_s28  ;;  %p2087_p5 = scmp.lt.s32.totalorder %s2078_s9, %s2078_s9 }
  0x15   : > { %p2069_p11 = pneg %p2335_p10 }
  0x16   : > { %p2088_p7 = por %p2087_p5, %p2086_p3 }
  0x17   : > { %p2081_p13 = pnand %p2079_p12, %p2069_p11 }
  0x19   : > { %p2082_p0 = pneg %p2081_p13 }
  0x1b   : > { %p2089_p9 = pnand %p2088_p7, %p2082_p0 }
  0x1d   : > { %2092 = shalt.err (!%p2089_p9)
}
  0x1e   : > { %s2250_s10 = smov 512   ;;  %s2251_s11 = smov 32  }
  0x1f   : > { %1938 = dma.hbm_to_vmem [thread:$0]  (!%p2335_p10), %s2506_s1, 8192, %s177_s28, [#allocation6], %s2250_s10, %s2250_s10, %s2251_s11  }
  0x20   : > { %s2104_s14 = scalar_lea.vmem %s191_s6, 128  ;;  %p2112_p2 = scmp.lt.s32.totalorder %s191_s6, %s191_s6 }
  0x21   : > { %p2105_p1 = scmp.ne.s32.totalorder %s191_s6, %s2104_s14  ;;  %p2113_p6 = scmp.lt.s32.totalorder %s2104_s14, %s2104_s14 }
  0x23   : > { %p2107_p12 = pnand %p2105_p1, %p2069_p11  ;;  %p2114_p3 = por %p2113_p6, %p2112_p2 }
  0x25   : > { %p2108_p13 = pneg %p2107_p12 }
  0x27   : > { %p2115_p0 = pnand %p2114_p3, %p2108_p13 }
  0x29   : > { %2118 = shalt.err (!%p2115_p0)
}
  0x2a   : > { %1941 = dma.hbm_to_vmem [thread:$0]  (!%p2335_p10), %s2507_s2, 128, %s191_s6, [#allocation6]  }
  0x2b   : > { %s2130_s17 = scalar_lea.vmem %s201_s8, 8192  ;;  %p2138_p9 = scmp.lt.s32.totalorder %s201_s8, %s201_s8 }
  0x2c   : > { %p2131_p5 = scmp.ne.s32.totalorder %s201_s8, %s2130_s17  ;;  %p2139_p12 = scmp.lt.s32.totalorder %s2130_s17, %s2130_s17 }
  0x2e   : > { %p2133_p7 = pnand %p2131_p5, %p2069_p11  ;;  %p2140_p4 = por %p2139_p12, %p2138_p9 }
  0x30   : > { %p2134_p1 = pneg %p2133_p7 }
  0x32   : > { %p2141_p2 = pnand %p2140_p4, %p2134_p1 }
  0x34   : > { %2144 = shalt.err (!%p2141_p2)
}
  0x35   : > { %s2252_s23 = smov 64   ;;  %s2253_s27 = smov 4  }
  0x36   : > { %1944 = dma.hbm_to_vmem [thread:$0]  (!%p2335_p10), %s2508_s3, 8192, %s201_s8, [#allocation9], %s2252_s23, %s2252_s23, %s2253_s27  }
  0x37   : > { %s2366_s6 = sadd.s32 1, %s2245_s21   ;;  %s30_s9 = sadd.s32 1, %s2241_s20 }
  0x38   : > { %s27_s7 = ssub.s32 %s2245_s21, %s2366_s6  ;;  %p37_p6 = scmp.ne.s32.totalorder %s2241_s20, %s2237_s19 }
  0x39   : > { %p28_p4 = scmp.eq.s32.totalorder %s27_s7, 0  ;;  %p38_p11 = scmp.eq.s32.totalorder %s2245_s21, 0 }
  0x3a   : > { %p1956_p13 = scmp.lt.s32.totalorder %s2245_s21, 3  ;;  %p2519_p0 = scmp.eq.s32.totalorder %s2308_s22, 2 }
  0x3b   : > { %s2376_s10 = scalar_select %p28_p4, %s2241_s20, %s30_s9  }
  0x3c   : > { %p39_p3 = por %p38_p11, %p37_p6  ;;  %p2380_p5 = por %p2519_p0, %p37_p6 }
  0x3d   : > { %s217_s29 = sand.u32 1, %s2241_s20   ;;  %s1691_s12 = sshll.u32 %s2245_s21, 6 }
  0x3e   : > { %s2520_s11 = scalar_select %p2380_p5, 1, 0 }
  0x3f   : > { %s1690_s8 = sshll.u32 %s217_s29, 2  ;;  %s2389_s15 = scalar_lea.hbm %s2505_s0, %s1691_s12 }
  0x40   : > { %s221_s16 = scalar_lea.vmem [#allocation2], %s1690_s8  ;;  %p2391_p10 = pnand %p1956_p13, %p39_p3 }
  0x41   : > { %s228_s17 = sshll.u32 %s221_s16, 4  ;;  %s218_s27 = scalar_lea.sflag [#allocation3], %s217_s29  ;;  %s229_s17 = int_to_ptr.vmem [resolvable:$true] %s228_s17 }
  0x42   : > { %s2145_s28 = scalar_lea.hbm %s2389_s15, 64  ;;  %p2147_p1 = pneg %p2391_p10 }
  0x43   : > { %p2146_p7 = scmp.ne.s32.totalorder %s2389_s15, %s2145_s28  ;;  %s2150_s9 = scalar_lea.hbm %s2505_s0, 192 }
  0x44   : > { %p2151_p2 = scmp.lt.s32.totalorder %s2389_s15, %s2505_s0  ;;  %p2152_p4 = scmp.lt.s32.totalorder %s2150_s9, %s2145_s28 }
  0x45   : > { %p2148_p9 = pnand %p2147_p1, %p2146_p7 }
  0x46   : > { %p2153_p6 = por %p2152_p4, %p2151_p2 }
  0x47   : > { %p2149_p12 = pneg %p2148_p9 }
  0x49   : > { %p2154_p11 = pnand %p2153_p6, %p2149_p12 }
  0x4b   : > { %2157 = shalt.err (!%p2154_p11)
}
  0x4c   : > { %s2158_s13 = scalar_lea.vmem %s229_s17, 64  ;;  %s2254_s29 = smov [#allocation2]  }
  0x4d   : > { %p2159_p13 = scmp.ne.s32.totalorder %s229_s17, %s2158_s13  ;;  %s2163_s14 = sshll.u32 %s2254_s29, 4  ;;  %s2164_s14 = int_to_ptr.vmem [resolvable:$false] %s2163_s14 }
  0x4e   : > { %s2165_s16 = scalar_lea.vmem %s2164_s14, 128  ;;  %p2166_p7 = scmp.lt.s32.totalorder %s229_s17, %s2164_s14 }
  0x4f   : > { %p2161_p3 = pnand %p2159_p13, %p2147_p1  ;;  %p2167_p9 = scmp.lt.s32.totalorder %s2165_s16, %s2158_s13 }
  0x51   : > { %p2162_p0 = pneg %p2161_p3  ;;  %p2168_p5 = por %p2167_p9, %p2166_p7 }
  0x53   : > { %p2169_p8 = pnand %p2168_p5, %p2162_p0 }
  0x55   : > { %2172 = shalt.err (!%p2169_p8)
}
  0x56   : > { %1948 = dma.hbm_to_vmem [thread:$0]  (!%p2391_p10), %s2389_s15, 64, %s229_s17, %s218_s27  }
  0x57   : > { %p2522_p12 = scmp.ne.s32.totalorder %s2517_s26, 0 }
  0x58   : > { %s2412_s28 = sand.u32 (!%p2522_p12), 1, %s2237_s19   ;;  %p2523_p1 = scmp.ne.s32.totalorder (!%p2522_p12), %s2515_s24, 0 }
  0x59   : > { %237 = sbr.rel (%p2522_p12) target bundleno = 600 (0x258), region = 40  ;;  %s1693_s30 = sshll.u32 (!%p2522_p12), %s2412_s28, 2 }
  0x5a   : > { %s240_s7 = scalar_lea.sflag (!%p2522_p12), [#allocation3], %s2412_s28  ;;  %s2416_s9 = scalar_lea.vmem (!%p2522_p12), [#allocation2], %s1693_s30 }
  0x5e   : > { %2216 = dma.done.wait (%p2523_p1), %s240_s7, 64  }
  0x5f   : > { %2218 = vsyncadd (%p2523_p1), %s240_s7, 4294967232  ;;  %p2524_p8 = scmp.eq.s32.totalorder %s2308_s22, 0 }
  0x61   : > { %2220 = dma.done.wait (%p2524_p8), [#allocation6], 8320   ;;  %p2525_p5 = pmov %p2524_p8 }
  0x63   : > { %2222 = vsyncadd (%p2525_p5), [#allocation6], 4294958976  ;;  %p2526_p10 = pmov %p2525_p5 }
  0x64   : > { %p2527_p2 = pmov %p2525_p5 }
  0x65   : > { %2224 = dma.done.wait (%p2526_p10), [#allocation9], 8192  }
  0x66   : > { %2226 = vsyncadd (%p2527_p2), [#allocation9], 4294959104  ;;  %v2255_v0 = vmov 0   ;;  %v340_v1 = vld [vmem:[#allocation5 + $0x1c0] sm:$0xff]  ;;  %v341_v3 = vld [vmem:[#allocation5 + $0x1c8] sm:$0xff]  ;;  %s1697_s15 = sshll.u32 %s2412_s28, 3 }
  0x67   : > { %742 = vmatprep.mubr.bf16.mxu0 %v2255_v0  ;;  %783 = vmatprep.mubr.bf16.mxu1 %v2255_v0  ;;  %v344_v2 = vld [vmem:[#allocation5 + $0x1e0] sm:$0xff]  ;;  %v345_v5 = vld [vmem:[#allocation5 + $0x1e8] sm:$0xff]  ;;  %v342_v60 = vld [vmem:[#allocation5 + $0x1d0] sm:$0xff]  ;;  %s1828_s17 = sshll.u32 %s2308_s22, 7  ;;  %s281_s23 = scalar_lea.vmem [#allocation10], %s1697_s15 }
  0x68   : > { %v1755_v4 = vcombine.high %v340_v1, %v344_v2  ;;  %v1754_v6 = vcombine.low %v340_v1, %v344_v2  ;;  %v332_v7 = vld [vmem:[#allocation5 + $0x180] sm:$0xff]  ;;  %v1757_v9 = vcombine.high %v341_v3, %v345_v5  ;;  %v1756_v10 = vcombine.low %v341_v3, %v345_v5  ;;  %v333_v12 = vld [vmem:[#allocation5 + $0x188] sm:$0xff]  ;;  %v346_v63 = vld [vmem:[#allocation5 + $0x1f0] sm:$0xff]  ;;  %s1585_s27 = sshll.u32 %s281_s23, 4  ;;  %s2469_s13 = scalar_lea.hbm %s2510_s5, %s1828_s17  ;;  %s1586_s27 = int_to_ptr.vmem [resolvable:$true] %s1585_s27 }
  0x69   : > { %v336_v8 = vld [vmem:[#allocation5 + $0x1a0] sm:$0xff]  ;;  %v337_v13 = vld [vmem:[#allocation5 + $0x1a8] sm:$0xff]  ;;  %v343_v2 = vld [vmem:[#allocation5 + $0x1d8] sm:$0xff]  ;;  %s1572_s29 = scalar_lea.sflag [#allocation4], %s2412_s28  ;;  %s2173_s14 = scalar_lea.vmem %s1586_s27, 128 }
  0x6a   : > { %v1747_v11 = vcombine.high %v332_v7, %v336_v8  ;;  %v324_v14 = vld [vmem:[#allocation5 + $0x140] sm:$0xff]  ;;  %710 = vmatprep.subr.bf16.mxu0 %v1755_v4  ;;  %v1749_v15 = vcombine.high %v333_v12, %v337_v13  ;;  %v325_v17 = vld [vmem:[#allocation5 + $0x148] sm:$0xff]  ;;  %751 = vmatprep.subr.bf16.mxu1 %v1757_v9  ;;  %v1746_v19 = vcombine.low %v332_v7, %v336_v8  ;;  %v347_v3 = vld [vmem:[#allocation5 + $0x1f8] sm:$0xff]  ;;  %p2174_p4 = scmp.ne.s32.totalorder %s1586_s27, %s2173_s14  ;;  %p2528_p6 = scmp.ne.s32.totalorder %s2520_s11, 0 }
  0x6b   : > { %v328_v16 = vld [vmem:[#allocation5 + $0x160] sm:$0xff]  ;;  %v329_v18 = vld [vmem:[#allocation5 + $0x168] sm:$0xff]  ;;  %711 = vmatpush1.bf16.msra.mxu0 %v1754_v6  ;;  %752 = vmatpush1.bf16.msra.mxu1 %v1756_v10  ;;  %v1748_v20 = vcombine.low %v333_v12, %v337_v13  ;;  %v334_v5 = vld [vmem:[#allocation5 + $0x190] sm:$0xff]  ;;  %v1759_v7 = vcombine.high %v342_v60, %v346_v63  ;;  %v1761_v10 = vcombine.high %v343_v2, %v347_v3  ;;  %s2256_s16 = smov [#allocation10]  }
  0x6c   : > { %712 = vmatprep.subr.bf16.mxu0 %v1747_v11  ;;  %v1739_v21 = vcombine.high %v324_v14, %v328_v16  ;;  %753 = vmatprep.subr.bf16.mxu1 %v1749_v15  ;;  %v1741_v22 = vcombine.high %v325_v17, %v329_v18  ;;  %v316_v23 = vld [vmem:[#allocation5 + $0x100] sm:$0xff]  ;;  %v317_v25 = vld [vmem:[#allocation5 + $0x108] sm:$0xff]  ;;  %v1738_v27 = vcombine.low %v324_v14, %v328_v16  ;;  %v338_v8 = vld [vmem:[#allocation5 + $0x1b0] sm:$0xff]  ;;  %p2175_p11 = pnand %p2174_p4, %p2528_p6  ;;  %s2177_s30 = sshll.u32 %s2256_s16, 4  ;;  %s2178_s30 = int_to_ptr.vmem [resolvable:$false] %s2177_s30 }
  0x6d   : > { %v320_v24 = vld [vmem:[#allocation5 + $0x120] sm:$0xff]  ;;  %v321_v26 = vld [vmem:[#allocation5 + $0x128] sm:$0xff]  ;;  %v1740_v28 = vcombine.low %v325_v17, %v329_v18  ;;  %v2433_v9 = vld [vmem:[%s2416_s9] sm:$0xf]  ;;  %v1758_v13 = vcombine.low %v342_v60, %v346_v63  ;;  %v1760_v15 = vcombine.low %v343_v2, %v347_v3  ;;  %v1751_v16 = vcombine.high %v334_v5, %v338_v8  ;;  %s2179_s22 = scalar_lea.vmem %s2178_s30, 256  ;;  %p2180_p3 = scmp.lt.s32.totalorder %s1586_s27, %s2178_s30 }
  0x6e   : > { %v1731_v29 = vcombine.high %v316_v23, %v320_v24  ;;  %v1733_v30 = vcombine.high %v317_v25, %v321_v26  ;;  %v308_v31 = vld [vmem:[#allocation5 + $0xc0] sm:$0xff]  ;;  %v309_v33 = vld [vmem:[#allocation5 + $0xc8] sm:$0xff]  ;;  %v1730_v35 = vcombine.low %v316_v23, %v320_v24  ;;  %v1732_v36 = vcombine.low %v317_v25, %v321_v26  ;;  %v335_v11 = vld [vmem:[#allocation5 + $0x198] sm:$0xff]  ;;  %p2176_p13 = pneg %p2175_p11  ;;  %p2181_p0 = scmp.lt.s32.totalorder %s2179_s22, %s2173_s14 }
  0x6f   : > { %713 = vmatpush1.bf16.msra.mxu0 %v1746_v19  ;;  %754 = vmatpush1.bf16.msra.mxu1 %v1748_v20  ;;  %v312_v32 = vld [vmem:[#allocation5 + $0xe0] sm:$0xff]  ;;  %v313_v34 = vld [vmem:[#allocation5 + $0xe8] sm:$0xff]  ;;  %v339_v12 = vld [vmem:[#allocation5 + $0x1b8] sm:$0xff] }
  0x70   : > { %714 = vmatprep.subr.bf16.mxu0 %v1739_v21  ;;  %755 = vmatprep.subr.bf16.mxu1 %v1741_v22  ;;  %v1723_v37 = vcombine.high %v308_v31, %v312_v32  ;;  %v1725_v38 = vcombine.high %v309_v33, %v313_v34  ;;  %v300_v39 = vld [vmem:[#allocation5 + $0x80] sm:$0xff]  ;;  %v301_v41 = vld [vmem:[#allocation5 + $0x88] sm:$0xff]  ;;  %v1722_v43 = vcombine.low %v308_v31, %v312_v32  ;;  %v326_v14 = vld [vmem:[#allocation5 + $0x150] sm:$0xff]  ;;  %p2182_p7 = por %p2181_p0, %p2180_p3 }
  0x71   : > { %v304_v40 = vld [vmem:[#allocation5 + $0xa0] sm:$0xff]  ;;  %v305_v42 = vld [vmem:[#allocation5 + $0xa8] sm:$0xff]  ;;  %v1724_v44 = vcombine.low %v309_v33, %v313_v34  ;;  %v330_v17 = vld [vmem:[#allocation5 + $0x170] sm:$0xff]  ;;  %v1753_v18 = vcombine.high %v335_v11, %v339_v12  ;;  %v1750_v21 = vcombine.low %v334_v5, %v338_v8  ;;  %v1752_v23 = vcombine.low %v335_v11, %v339_v12 }
  0x72   : > { %v1715_v45 = vcombine.high %v300_v39, %v304_v40  ;;  %v1717_v46 = vcombine.high %v301_v41, %v305_v42  ;;  %v292_v47 = vld [vmem:[#allocation5 + $0x40] sm:$0xff]  ;;  %v293_v49 = vld [vmem:[#allocation5 + $0x48] sm:$0xff]  ;;  %v1714_v51 = vcombine.low %v300_v39, %v304_v40  ;;  %v1716_v52 = vcombine.low %v301_v41, %v305_v42  ;;  %v327_v19 = vld [vmem:[#allocation5 + $0x158] sm:$0xff]  ;;  %p2183_p9 = pnand %p2182_p7, %p2176_p13 }
  0x73   : > { %715 = vmatpush1.bf16.msra.mxu0 %v1738_v27  ;;  %756 = vmatpush1.bf16.msra.mxu1 %v1740_v28  ;;  %v296_v48 = vld [vmem:[#allocation5 + $0x60] sm:$0xff]  ;;  %v297_v50 = vld [vmem:[#allocation5 + $0x68] sm:$0xff]  ;;  %v331_v20 = vld [vmem:[#allocation5 + $0x178] sm:$0xff]  ;;  %v1743_v24 = vcombine.high %v326_v14, %v330_v17 }
  0x74   : > { %716 = vmatprep.subr.bf16.mxu0 %v1731_v29  ;;  %757 = vmatprep.subr.bf16.mxu1 %v1733_v30  ;;  %v1707_v53 = vcombine.high %v292_v47, %v296_v48  ;;  %v284_v54 = vld [vmem:[#allocation5] sm:$0xff]  ;;  %v1709_v56 = vcombine.high %v293_v49, %v297_v50  ;;  %v285_v57 = vld [vmem:[#allocation5 + $0x8] sm:$0xff]  ;;  %v1706_v59 = vcombine.low %v292_v47, %v296_v48  ;;  %v318_v22 = vld [vmem:[#allocation5 + $0x110] sm:$0xff] }
  0x75   : > { %v288_v55 = vld [vmem:[#allocation5 + $0x20] sm:$0xff]  ;;  %v289_v58 = vld [vmem:[#allocation5 + $0x28] sm:$0xff]  ;;  %v1708_v61 = vcombine.low %v293_v49, %v297_v50  ;;  %v322_v25 = vld [vmem:[#allocation5 + $0x130] sm:$0xff]  ;;  %v1745_v26 = vcombine.high %v327_v19, %v331_v20  ;;  %v1742_v29 = vcombine.low %v326_v14, %v330_v17  ;;  %v1744_v31 = vcombine.low %v327_v19, %v331_v20 }
  0x76   : > { %v1699_v62 = vcombine.high %v284_v54, %v288_v55  ;;  %v1701_v1 = vcombine.high %v285_v57, %v289_v58  ;;  %v1698_v4 = vcombine.low %v284_v54, %v288_v55  ;;  %v1700_v6 = vcombine.low %v285_v57, %v289_v58  ;;  %v319_v27 = vld [vmem:[#allocation5 + $0x118] sm:$0xff]  ;;  %v310_v30 = vld [vmem:[#allocation5 + $0xd0] sm:$0xff]  ;;  %v2002_v3 = vld [vmem:[#allocation8 + $0xf8] sm:$0xff]  }
  0x77   : > { %717 = vmatpush1.bf16.msra.mxu0 %v1730_v35  ;;  %758 = vmatpush1.bf16.msra.mxu1 %v1732_v36  ;;  %v323_v28 = vld [vmem:[#allocation5 + $0x138] sm:$0xff]  ;;  %v1735_v32 = vcombine.high %v318_v22, %v322_v25  ;;  %v314_v33 = vld [vmem:[#allocation5 + $0xf0] sm:$0xff]  ;;  %v2003_v5 = vld [vmem:[#allocation8 + $0x38] sm:$0xff]  }
  0x78   : > { %718 = vmatprep.subr.bf16.mxu0 %v1723_v37  ;;  %759 = vmatprep.subr.bf16.mxu1 %v1725_v38  ;;  %v1737_v34 = vcombine.high %v319_v27, %v323_v28  ;;  %v311_v35 = vld [vmem:[#allocation5 + $0xd8] sm:$0xff]  ;;  %v1734_v37 = vcombine.low %v318_v22, %v322_v25  ;;  %v302_v38 = vld [vmem:[#allocation5 + $0x90] sm:$0xff]  ;;  %v1736_v40 = vcombine.low %v319_v27, %v323_v28  ;;  %v2014_v17 = vld [vmem:[#allocation8 + $0xe0] sm:$0xff]  }
  0x79   : > { %v315_v36 = vld [vmem:[#allocation5 + $0xf8] sm:$0xff]  ;;  %v306_v39 = vld [vmem:[#allocation5 + $0xb0] sm:$0xff]  ;;  %v2016_v19 = vld [vmem:[#allocation8 + $0xa0] sm:$0xff]  }
  0x7a   : > { %v303_v41 = vld [vmem:[#allocation5 + $0x98] sm:$0xff]  ;;  %v1728_v47 = vcombine.low %v311_v35, %v315_v36  ;;  %v1719_v48 = vcombine.high %v302_v38, %v306_v39  ;;  %v290_v54 = vld [vmem:[#allocation5 + $0x30] sm:$0xff]  ;;  %v2017_v20 = vld [vmem:[#allocation8 + $0x58] sm:$0xff]  }
  0x7b   : > { %719 = vmatpush1.bf16.msra.mxu0 %v1722_v43  ;;  %760 = vmatpush1.bf16.msra.mxu1 %v1724_v44  ;;  %v307_v42 = vld [vmem:[#allocation5 + $0xb8] sm:$0xff]  ;;  %v1729_v43 = vcombine.high %v311_v35, %v315_v36  ;;  %v1726_v44 = vcombine.low %v310_v30, %v314_v33  ;;  %v2009_v12 = vld [vmem:[#allocation8 + $0x68] sm:$0xff]   ;;  %v2020_v22 = vld [vmem:[#allocation8 + $0x98] sm:$0xff]  }
  0x7c   : > { %720 = vmatprep.subr.bf16.mxu0 %v1715_v45  ;;  %761 = vmatprep.subr.bf16.mxu1 %v1717_v46  ;;  %v294_v45 = vld [vmem:[#allocation5 + $0x50] sm:$0xff]  ;;  %v295_v49 = vld [vmem:[#allocation5 + $0x58] sm:$0xff]  ;;  %v1720_v55 = vcombine.low %v303_v41, %v307_v42  ;;  %v2033_v35 = vld [vmem:[#allocation8 + $0x178] sm:$0xff]  }
  0x7d   : > { %v298_v46 = vld [vmem:[#allocation5 + $0x70] sm:$0xff]  ;;  %v299_v50 = vld [vmem:[#allocation5 + $0x78] sm:$0xff]  ;;  %v2034_v36 = vld [vmem:[#allocation8 + $0x1f8] sm:$0xff]  }
  0x7e   : > { %v287_v57 = vld [vmem:[#allocation5 + $0x18] sm:$0xff]  ;;  %v1710_v60 = vcombine.low %v294_v45, %v298_v46  ;;  %v2011_v14 = vld [vmem:[#allocation8 + $0x28] sm:$0xff]  }
  0x7f   : > { %721 = vmatpush1.bf16.msra.mxu0 %v1714_v51  ;;  %762 = vmatpush1.bf16.msra.mxu1 %v1716_v52  ;;  %v1721_v51 = vcombine.high %v303_v41, %v307_v42  ;;  %v1718_v52 = vcombine.low %v302_v38, %v306_v39  ;;  %v291_v58 = vld [vmem:[#allocation5 + $0x38] sm:$0xff]  ;;  %v2025_v27 = vld [vmem:[#allocation8 + $0x48] sm:$0xff]  }
  0x80   : > { %722 = vmatprep.subr.bf16.mxu0 %v1707_v53  ;;  %763 = vmatprep.subr.bf16.mxu1 %v1709_v56  ;;  %v286_v53 = vld [vmem:[#allocation5 + $0x10] sm:$0xff]  ;;  %v1711_v56 = vcombine.high %v294_v45, %v298_v46  ;;  %v1705_v63 = vcombine.high %v287_v57, %v291_v58  ;;  %v2006_v8 = vld [vmem:[#allocation8 + $0xf0] sm:$0xff]  }
  0x81   : > { %v1702_v2 = vcombine.low %v286_v53, %v290_v54  ;;  %v2008_v11 = vld [vmem:[#allocation8 + $0xb0] sm:$0xff]   ;;  %v2026_v28 = vld [vmem:[#allocation8 + $0xc8] sm:$0xff]  }
  0x82   : > { %v2023_v25 = vld [vmem:[#allocation8 + $0x10] sm:$0xff]  }
  0x83   : > { %723 = vmatpush1.bf16.msra.mxu0 %v1706_v59  ;;  %764 = vmatpush1.bf16.msra.mxu1 %v1708_v61  ;;  %v1713_v59 = vcombine.high %v295_v49, %v299_v50  ;;  %v1712_v61 = vcombine.low %v295_v49, %v299_v50 }
  0x84   : > { %724 = vmatprep.subr.bf16.mxu0 %v1699_v62  ;;  %765 = vmatprep.subr.bf16.mxu1 %v1701_v1  ;;  %v1703_v62 = vcombine.high %v286_v53, %v290_v54  ;;  %v2001_v1 = vld [vmem:[#allocation8 + $0x78] sm:$0xff]  }
  0x87   : > { %725 = vmatpush1.bf16.msra.mxu0 %v1698_v4  ;;  %766 = vmatpush1.bf16.msra.mxu1 %v1700_v6  ;;  %v1704_v4 = vcombine.low %v287_v57, %v291_v58  ;;  %v2004_v6 = vld [vmem:[#allocation8 + $0xb8] sm:$0xff]  }
  0x88   : > { %792 = vmatprep.subr.bf16.mxu0 %v1759_v7  ;;  %833 = vmatprep.subr.bf16.mxu1 %v1761_v10  ;;  %v2005_v7 = vld [vmem:[#allocation8 + $0x70] sm:$0xff]  }
  0x89   : > { %v2007_v10 = vld [vmem:[#allocation8 + $0x30] sm:$0xff]  }
  0x8a   : > { %743 = vmatmul.mubr.bf16.vlgmr.msra.gmra.mxu0 %v2433_v9  ;;  %784 = vmatmul.mubr.bf16.vlgmr.msra.gmra.mxu1 %v2433_v9 }
  0x8b   : > { %793 = vmatpush1.bf16.msra.mxu0 %v1758_v13  ;;  %834 = vmatpush1.bf16.msra.mxu1 %v1760_v15  ;;  %v2010_v13 = vld [vmem:[#allocation8 + $0xe8] sm:$0xff]  }
  0x8c   : > { %794 = vmatprep.subr.bf16.mxu0 %v1751_v16  ;;  %835 = vmatprep.subr.bf16.mxu1 %v1753_v18  ;;  %v2012_v15 = vld [vmem:[#allocation8 + $0xa8] sm:$0xff]   ;;  %v2013_v16 = vld [vmem:[#allocation8 + $0x60] sm:$0xff]  }
  0x8d   : > { %824 = vmatprep.mubr.bf16.mxu0 %v2255_v0  ;;  %865 = vmatprep.mubr.bf16.mxu1 %v2255_v0  ;;  %v1727_v0 = vcombine.high %v310_v30, %v314_v33  ;;  %v2015_v18 = vld [vmem:[#allocation8 + $0x20] sm:$0xff]   ;;  %v2028_v30 = vld [vmem:[#allocation8 + $0x88] sm:$0xff]  }
  0x8e   : > { %v2031_v33 = vld [vmem:[#allocation8] sm:$0xff]  }
  0x8f   : > { %795 = vmatpush1.bf16.msra.mxu0 %v1750_v21  ;;  %836 = vmatpush1.bf16.msra.mxu1 %v1752_v23  ;;  %v2019_v21 = vld [vmem:[#allocation8 + $0x18] sm:$0xff]   ;;  %v2021_v23 = vld [vmem:[#allocation8 + $0x50] sm:$0xff]  }
  0x90   : > { %796 = vmatprep.subr.bf16.mxu0 %v1743_v24  ;;  %837 = vmatprep.subr.bf16.mxu1 %v1745_v26  ;;  %v2022_v24 = vld [vmem:[#allocation8 + $0xd0] sm:$0xff]  }
  0x91   : > { %v2024_v26 = vld [vmem:[#allocation8 + $0x90] sm:$0xff]  }
  0x93   : > { %797 = vmatpush1.bf16.msra.mxu0 %v1742_v29  ;;  %838 = vmatpush1.bf16.msra.mxu1 %v1744_v31  ;;  %v2027_v29 = vld [vmem:[#allocation8 + $0x8] sm:$0xff]   ;;  %v2029_v31 = vld [vmem:[#allocation8 + $0x40] sm:$0xff]  }
  0x94   : > { %798 = vmatprep.subr.bf16.mxu0 %v1735_v32  ;;  %839 = vmatprep.subr.bf16.mxu1 %v1737_v34  ;;  %v2030_v32 = vld [vmem:[#allocation8 + $0xc0] sm:$0xff]  }
  0x95   : > { %v2032_v34 = vld [vmem:[#allocation8 + $0x80] sm:$0xff]  }
  0x97   : > { %799 = vmatpush1.bf16.msra.mxu0 %v1734_v37  ;;  %840 = vmatpush1.bf16.msra.mxu1 %v1736_v40  ;;  %v350_v37 = vlaneseq  ;;  %v2444_v40 = vld [vmem:[#allocation7] sm:$0xff] }
  0x98   : > { %800 = vmatprep.subr.bf16.mxu0 %v1727_v0  ;;  %841 = vmatprep.subr.bf16.mxu1 %v1729_v43 }
  0x99   : > { %v2441_v38 = vshrl.u32 %v350_v37, 7 }
  0x9b   : > { %801 = vmatpush1.bf16.msra.mxu0 %v1726_v44  ;;  %842 = vmatpush1.bf16.msra.mxu1 %v1728_v47  ;;  %v352_v39 = vsub.s32 0, %v2441_v38  ;;  %v360_v0 = vsub.s32 2, %v2441_v38  ;;  %v356_v41 = vsub.s32 1, %v2441_v38  ;;  %v364_v42 = vsub.s32 3, %v2441_v38 }
  0x9c   : > { %802 = vmatprep.subr.bf16.mxu0 %v1719_v48  ;;  %843 = vmatprep.subr.bf16.mxu1 %v1721_v51 }
  0x9d   : > { %v353_v43 = vrot.slane %v2444_v40, %v352_v39  ;;  %v361_v44 = vrot.slane %v2444_v40, %v360_v0  ;;  %v357_v45 = vrot.slane %v2444_v40, %v356_v41  ;;  %v365_v47 = vrot.slane %v2444_v40, %v364_v42  ;;  %v2060_v39 = vld [vmem:[#allocation8 + $0x188] sm:$0xff]   ;;  %v2061_v0 = vld [vmem:[#allocation8 + $0x140] sm:$0xff]  }
  0x9e   : > { %v2062_v42 = vld [vmem:[#allocation8 + $0x1c0] sm:$0xff]  }
  0x9f   : > { %803 = vmatpush1.bf16.msra.mxu0 %v1718_v52  ;;  %844 = vmatpush1.bf16.msra.mxu1 %v1720_v55 }
  0xa0   : > { %804 = vmatprep.subr.bf16.mxu0 %v1711_v56  ;;  %845 = vmatprep.subr.bf16.mxu1 %v1713_v59 }
  0xa3   : > { %805 = vmatpush1.bf16.msra.mxu0 %v1710_v60  ;;  %846 = vmatpush1.bf16.msra.mxu1 %v1712_v61 }
  0xa4   : > { %806 = vmatprep.subr.bf16.mxu0 %v1703_v62  ;;  %847 = vmatprep.subr.bf16.mxu1 %v1705_v63 }
  0xa7   : > { %807 = vmatpush1.bf16.msra.mxu0 %v1702_v2  ;;  %848 = vmatpush1.bf16.msra.mxu1 %v1704_v4  ;;  %v2035_v2 = vld [vmem:[#allocation8 + $0x138] sm:$0xff]  }
  0xa8   : > { %1831 = vmatprep.subr.bf16.mxu0 %v2001_v1  ;;  %1853 = vmatprep.subr.bf16.mxu1 %v2002_v3 }
  0xaa   : > { %825 = vmatmul.mubr.bf16.vlgmr.msra.gmra.mxu0 %v2433_v9  ;;  %866 = vmatmul.mubr.bf16.vlgmr.msra.gmra.mxu1 %v2433_v9  ;;  %v2018_v9 = vld [vmem:[#allocation8 + $0xd8] sm:$0xff]  }
  0xab   : > { %1832 = vmatpush3.bf16.msra.mxu0 %v2003_v5  ;;  %1854 = vmatpush3.bf16.msra.mxu1 %v2004_v6  ;;  %v2036_v5 = vld [vmem:[#allocation8 + $0x1b8] sm:$0xff]   ;;  %v2037_v6 = vld [vmem:[#allocation8 + $0x170] sm:$0xff]  }
  0xac   : > { %1833 = vmatprep.subr.bf16.mxu0 %v2005_v7  ;;  %1855 = vmatprep.subr.bf16.mxu1 %v2006_v8  ;;  %v2038_v7 = vld [vmem:[#allocation8 + $0x1f0] sm:$0xff]  }
  0xad   : > { %v2039_v8 = vld [vmem:[#allocation8 + $0x130] sm:$0xff]  }
  0xaf   : > { %1834 = vmatpush3.bf16.msra.mxu0 %v2007_v10  ;;  %1856 = vmatpush3.bf16.msra.mxu1 %v2008_v11  ;;  %v2040_v10 = vld [vmem:[#allocation8 + $0x1b0] sm:$0xff]   ;;  %v2041_v11 = vld [vmem:[#allocation8 + $0x168] sm:$0xff]  }
  0xb0   : > { %1835 = vmatprep.subr.bf16.mxu0 %v2009_v12  ;;  %1857 = vmatprep.subr.bf16.mxu1 %v2010_v13  ;;  %v2042_v12 = vld [vmem:[#allocation8 + $0x1e8] sm:$0xff]  }
  0xb1   : > { %v2043_v13 = vld [vmem:[#allocation8 + $0x128] sm:$0xff]  }
  0xb3   : > { %1836 = vmatpush3.bf16.msra.mxu0 %v2011_v14  ;;  %1858 = vmatpush3.bf16.msra.mxu1 %v2012_v15  ;;  %v2044_v14 = vld [vmem:[#allocation8 + $0x1a8] sm:$0xff]   ;;  %v2045_v15 = vld [vmem:[#allocation8 + $0x160] sm:$0xff]  }
  0xb4   : > { %1837 = vmatprep.subr.bf16.mxu0 %v2013_v16  ;;  %1859 = vmatprep.subr.bf16.mxu1 %v2014_v17  ;;  %v2046_v16 = vld [vmem:[#allocation8 + $0x1e0] sm:$0xff]  }
  0xb5   : > { %v2047_v17 = vld [vmem:[#allocation8 + $0x120] sm:$0xff]  }
  0xb7   : > { %1838 = vmatpush3.bf16.msra.mxu0 %v2015_v18  ;;  %1860 = vmatpush3.bf16.msra.mxu1 %v2016_v19  ;;  %v2048_v18 = vld [vmem:[#allocation8 + $0x1a0] sm:$0xff]   ;;  %v2049_v19 = vld [vmem:[#allocation8 + $0x158] sm:$0xff]  }
  0xb8   : > { %1839 = vmatprep.subr.bf16.mxu0 %v2017_v20  ;;  %1861 = vmatprep.subr.bf16.mxu1 %v2018_v9  ;;  %v2050_v20 = vld [vmem:[#allocation8 + $0x1d8] sm:$0xff]  }
  0xb9   : > { %v2051_v9 = vld [vmem:[#allocation8 + $0x118] sm:$0xff]  }
  0xbb   : > { %1840 = vmatpush3.bf16.msra.mxu0 %v2019_v21  ;;  %1862 = vmatpush3.bf16.msra.mxu1 %v2020_v22  ;;  %v2052_v21 = vld [vmem:[#allocation8 + $0x198] sm:$0xff]   ;;  %v2053_v22 = vld [vmem:[#allocation8 + $0x150] sm:$0xff]  }
  0xbc   : > { %1841 = vmatprep.subr.bf16.mxu0 %v2021_v23  ;;  %1863 = vmatprep.subr.bf16.mxu1 %v2022_v24  ;;  %v2054_v23 = vld [vmem:[#allocation8 + $0x1d0] sm:$0xff]   ;;  %v368_v24 = vsub.s32 4, %v2441_v38 }
  0xbf   : > { %1842 = vmatpush3.bf16.msra.mxu0 %v2023_v25  ;;  %1864 = vmatpush3.bf16.msra.mxu1 %v2024_v26  ;;  %v376_v25 = vsub.s32 6, %v2441_v38  ;;  %v2055_v26 = vld [vmem:[#allocation8 + $0x110] sm:$0xff]  }
  0xc0   : > { %1843 = vmatprep.subr.bf16.mxu0 %v2025_v27  ;;  %1865 = vmatprep.subr.bf16.mxu1 %v2026_v28  ;;  %v372_v27 = vsub.s32 5, %v2441_v38  ;;  %v2056_v28 = vld [vmem:[#allocation8 + $0x190] sm:$0xff]  }
  0xc3   : > { %1844 = vmatpush3.bf16.msra.mxu0 %v2027_v29  ;;  %1866 = vmatpush3.bf16.msra.mxu1 %v2028_v30  ;;  %v380_v29 = vsub.s32 7, %v2441_v38  ;;  %v2057_v30 = vld [vmem:[#allocation8 + $0x148] sm:$0xff]  }
  0xc4   : > { %1845 = vmatprep.subr.bf16.mxu0 %v2029_v31  ;;  %1867 = vmatprep.subr.bf16.mxu1 %v2030_v32  ;;  %v369_v31 = vrot.slane %v2444_v40, %v368_v24  ;;  %v2058_v32 = vld [vmem:[#allocation8 + $0x1c8] sm:$0xff]  }
  0xc5   : > { %v381_v37 = vrot.slane %v2444_v40, %v380_v29 }
  0xc7   : > { %1846 = vmatpush3.bf16.msra.mxu0 %v2031_v33  ;;  %1868 = vmatpush3.bf16.msra.mxu1 %v2032_v34  ;;  %v377_v33 = vrot.slane %v2444_v40, %v376_v25  ;;  %v373_v34 = vrot.slane %v2444_v40, %v372_v27  ;;  %v2064_v40 = vld [vmem:[#allocation8 + $0x180] sm:$0xff]  }
  0xc8   : > { %1875 = vmatprep.subr.bf16.mxu0 %v2033_v35  ;;  %1897 = vmatprep.subr.bf16.mxu1 %v2034_v36  ;;  %v2059_v35 = vld [vmem:[#allocation8 + $0x108] sm:$0xff]  }
 0x14a   : > { %v744_v46 = vpop.f32.mrf.mxu0  ;;  %v785_v49 = vpop.f32.mrf.mxu1 }
 0x14b   : > { %v745_v48 = vadd.f32 %v744_v46, %v353_v43  ;;  %v786_v50 = vadd.f32 %v785_v49, %v361_v44 }
 0x14c   : > { %v746_v51 = vpop.f32.mrf.mxu0  ;;  %v787_v53 = vpop.f32.mrf.mxu1 }
 0x14d   : > { %v747_v52 = vadd.f32 %v746_v51, %v357_v45  ;;  %v874_v54 = vmax.f32 %v745_v48, 0.0  ;;  %v876_v55 = vmax.f32 %v786_v50, 0.0  ;;  %v788_v56 = vadd.f32 %v787_v53, %v365_v47  ;;  %v2063_v47 = vld [vmem:[#allocation8 + $0x100] sm:$0xff]  }
 0x14e   : > { %v748_v57 = vpop.f32.mrf.mxu0  ;;  %v789_v59 = vpop.f32.mrf.mxu1 }
 0x14f   : > { %v875_v58 = vmax.f32 %v747_v52, 0.0  ;;  %v877_v60 = vmax.f32 %v788_v56, 0.0  ;;  %v884_v62 = vpack.c.bf16 %v876_v55, %v876_v55  ;;  %v882_v3 = vpack.c.bf16 %v874_v54, %v874_v54 }
 0x150   : > { %v749_v61 = vpop.f32.mrf.mxu0  ;;  %v790_v1 = vpop.f32.mrf.mxu1 }
 0x151   : > { %v883_v63 = vpack.c.bf16 %v875_v58, %v875_v58  ;;  %v885_v4 = vpack.c.bf16 %v877_v60, %v877_v60 }
 0x153   : > { %1441 = vmatprep.mubr.bf16.mxu0 %v883_v63  ;;  %1481 = vmatprep.mubr.bf16.mxu1 %v885_v4 }
 0x154   : > { %1442 = vmatmul.mubr.bf16.vlgmr.msra.gmra.mxu0 %v882_v3  ;;  %1482 = vmatmul.mubr.bf16.vlgmr.msra.gmra.mxu1 %v884_v62 }
 0x155   : > { %1876 = vmatpush3.bf16.msra.mxu0 %v2035_v2  ;;  %1898 = vmatpush3.bf16.msra.mxu1 %v2036_v5 }
 0x156   : > { %1877 = vmatprep.subr.bf16.mxu0 %v2037_v6  ;;  %1899 = vmatprep.subr.bf16.mxu1 %v2038_v7  ;;  %v1762_v7 = vld [vmem:[%s2509_s4] ss:$0 sm:$0xff] }
 0x159   : > { %1878 = vmatpush3.bf16.msra.mxu0 %v2039_v8  ;;  %1900 = vmatpush3.bf16.msra.mxu1 %v2040_v10 }
 0x15a   : > { %1879 = vmatprep.subr.bf16.mxu0 %v2041_v11  ;;  %1901 = vmatprep.subr.bf16.mxu1 %v2042_v12 }
 0x15d   : > { %1880 = vmatpush3.bf16.msra.mxu0 %v2043_v13  ;;  %1902 = vmatpush3.bf16.msra.mxu1 %v2044_v14 }
 0x15e   : > { %1881 = vmatprep.subr.bf16.mxu0 %v2045_v15  ;;  %1903 = vmatprep.subr.bf16.mxu1 %v2046_v16 }
 0x161   : > { %1882 = vmatpush3.bf16.msra.mxu0 %v2047_v17  ;;  %1904 = vmatpush3.bf16.msra.mxu1 %v2048_v18 }
 0x162   : > { %1883 = vmatprep.subr.bf16.mxu0 %v2049_v19  ;;  %1905 = vmatprep.subr.bf16.mxu1 %v2050_v20 }
 0x165   : > { %1884 = vmatpush3.bf16.msra.mxu0 %v2051_v9  ;;  %1906 = vmatpush3.bf16.msra.mxu1 %v2052_v21 }
 0x166   : > { %1885 = vmatprep.subr.bf16.mxu0 %v2053_v22  ;;  %1907 = vmatprep.subr.bf16.mxu1 %v2054_v23 }
 0x169   : > { %1886 = vmatpush3.bf16.msra.mxu0 %v2055_v26  ;;  %1908 = vmatpush3.bf16.msra.mxu1 %v2056_v28 }
 0x16a   : > { %v826_v36 = vpop.f32.mrf.mxu0  ;;  %1887 = vmatprep.subr.bf16.mxu0 %v2057_v30  ;;  %v867_v38 = vpop.f32.mrf.mxu1  ;;  %1909 = vmatprep.subr.bf16.mxu1 %v2058_v32 }
 0x16b   : > { %v827_v41 = vadd.f32 %v826_v36, %v369_v31  ;;  %v868_v43 = vadd.f32 %v867_v38, %v377_v33 }
 0x16c   : > { %v828_v44 = vpop.f32.mrf.mxu0  ;;  %v869_v46 = vpop.f32.mrf.mxu1 }
 0x16d   : > { %v829_v45 = vadd.f32 %v828_v44, %v373_v34  ;;  %1888 = vmatpush3.bf16.msra.mxu0 %v2059_v35  ;;  %v878_v48 = vmax.f32 %v827_v41, 0.0  ;;  %v880_v49 = vmax.f32 %v868_v43, 0.0  ;;  %v870_v50 = vadd.f32 %v869_v46, %v381_v37  ;;  %1910 = vmatpush3.bf16.msra.mxu1 %v2060_v39 }
 0x16e   : > { %v830_v51 = vpop.f32.mrf.mxu0  ;;  %1889 = vmatprep.subr.bf16.mxu0 %v2061_v0  ;;  %v871_v53 = vpop.f32.mrf.mxu1  ;;  %1911 = vmatprep.subr.bf16.mxu1 %v2062_v42 }
 0x16f   : > { %v879_v52 = vmax.f32 %v829_v45, 0.0  ;;  %v881_v54 = vmax.f32 %v870_v50, 0.0  ;;  %v888_v56 = vpack.c.bf16 %v880_v49, %v880_v49  ;;  %v886_v59 = vpack.c.bf16 %v878_v48, %v878_v48 }
 0x170   : > { %v831_v55 = vpop.f32.mrf.mxu0  ;;  %v872_v58 = vpop.f32.mrf.mxu1 }
 0x171   : > { %v887_v57 = vpack.c.bf16 %v879_v52, %v879_v52  ;;  %1890 = vmatpush3.bf16.msra.mxu0 %v2063_v47  ;;  %v889_v60 = vpack.c.bf16 %v881_v54, %v881_v54  ;;  %1912 = vmatpush3.bf16.msra.mxu1 %v2064_v40 }
 0x173   : > { %1521 = vmatprep.mubr.bf16.mxu0 %v887_v57  ;;  %1561 = vmatprep.mubr.bf16.mxu1 %v889_v60 }
 0x174   : > { %1522 = vmatmul.mubr.bf16.vlgmr.msra.gmra.mxu0 %v886_v59  ;;  %1562 = vmatmul.mubr.bf16.vlgmr.msra.gmra.mxu1 %v888_v56 }
 0x214   : > { %v1847_v61 = vpop.f32.mrf.mxu0  ;;  %v1869_v62 = vpop.f32.mrf.mxu1 }
 0x216   : > { %v1848_v63 = vpop.f32.mrf.mxu0  ;;  %v1870_v1 = vpop.f32.mrf.mxu1 }
 0x217   : > { %v1849_v6 = vadd.f32 %v1848_v63, %v1847_v61  ;;  %v1871_v11 = vadd.f32 %v1870_v1, %v1869_v62 }
 0x218   : > { %v1850_v2 = vpop.f32.mrf.mxu0  ;;  %v1872_v3 = vpop.f32.mrf.mxu1 }
 0x219   : > { %v1444_v8 = vadd.f32 %v1849_v6, %v1762_v7 }
 0x21a   : > { %v1851_v4 = vpop.f32.mrf.mxu0  ;;  %v1873_v5 = vpop.f32.mrf.mxu1 }
 0x21b   : > { %v1484_v14 = vadd.f32 %v1871_v11, %v1444_v8 }
 0x234   : > { %v1891_v10 = vpop.f32.mrf.mxu0  ;;  %v1913_v12 = vpop.f32.mrf.mxu1 }
 0x236   : > { %v1892_v13 = vpop.f32.mrf.mxu0  ;;  %v1914_v16 = vpop.f32.mrf.mxu1 }
 0x237   : > { %v1893_v15 = vadd.f32 %v1892_v13, %v1891_v10  ;;  %v1915_v19 = vadd.f32 %v1914_v16, %v1913_v12 }
 0x238   : > { %v1894_v17 = vpop.f32.mrf.mxu0  ;;  %v1916_v20 = vpop.f32.mrf.mxu1 }
 0x239   : > { %v1524_v18 = vadd.f32 %v1893_v15, %v1484_v14 }
 0x23a   : > { %v1895_v9 = vpop.f32.mrf.mxu0  ;;  %v1917_v22 = vpop.f32.mrf.mxu1 }
 0x23b   : > { %v1564_v21 = vadd.f32 %v1915_v19, %v1524_v18 }
 0x23d   : > { %2065 = vtanh.f32 %v1564_v21 }
 0x24a   : > { %v2066_v23 = vpop.eup %2065 }
 0x24b   : > { %1570 = vst [vmem:[%s281_s23] sm:$0xff] %v2066_v23 }
 0x24c   : > { %2186 = shalt.err (!%p2183_p9)
}
 0x24d   : > { %s2187_s7 = scalar_lea.hbm %s2469_s13, 128  ;;  %s2191_s24 = scalar_lea.hbm %s2510_s5, 384 }
 0x24e   : > { %p2188_p12 = scmp.ne.s32.totalorder %s2469_s13, %s2187_s7  ;;  %p2192_p5 = scmp.lt.s32.totalorder %s2469_s13, %s2510_s5 }
 0x24f   : > { %p2193_p10 = scmp.lt.s32.totalorder %s2191_s24, %s2187_s7 }
 0x250   : > { %p2189_p1 = pnand %p2188_p12, %p2528_p6 }
 0x251   : > { %p2194_p2 = por %p2193_p10, %p2192_p5 }
 0x252   : > { %p2190_p8 = pneg %p2189_p1 }
 0x254   : > { %p2195_p4 = pnand %p2194_p2, %p2190_p8 }
 0x256   : > { %2198 = shalt.err (!%p2195_p4)
}
 0x257   : > { %1933 = dma.vmem_to_hbm [thread:$0]  (%p2528_p6), %s1586_s27, 128, %s2469_s13, %s1572_s29  }
 0x258 PF: > { %p1960_p11 = scmp.ge.s32.totalorder %s2245_s21, 2  ;;  %s1597_s17 = sand.u32 1, %s2233_s18  }
 0x259   : > { %p2529_p13 = scmp.ne.s32.totalorder %s2516_s25, 0  ;;  %s1598_s23 = scalar_lea.sflag [#allocation4], %s1597_s17 }
 0x25b   : > { %p1950_p3 = pnand %p1960_p11, %p2529_p13 }
 0x25d   : > { %p1951_p0 = pneg %p1950_p3 }
 0x25f   : > { %2228 = dma.done.wait (%p1951_p0), %s1598_s23, 128  }
 0x260   : > { %2230 = vsyncadd (%p1951_p0), %s1598_s23, 4294967168  ;;  %p20_p7 = scmp.ge.s32.totalorder %s2366_s6, 5   ;;  %s2530_s18 = smov %s2237_s19 }
 0x261   : > { %s2531_s19 = smov %s2241_s20  ;;  %s2532_s20 = smov %s2376_s10 }
 0x262   : > { %s2533_s21 = smov %s2366_s6  ;;  %22 = sbr.rel (!%p20_p7) target bundleno = 7 (0x7), region = 97 }
 0x267   :  { %1603 = vsyncpa [#allocation3], 1 }
 0x268   :  { %1605 = vsyncpa [#allocation3 + $0x1], 1 }
 0x269   :  { %1606 = vsyncpa [#allocation6], 1 }
 0x26a   :  { %1607 = vsyncpa [#allocation9], 1 }
 0x26b   :  { %1608 = vsyncpa [#allocation4], 1 }
 0x26c   :  { %1610 = vsyncpa [#allocation4 + $0x1], 1 }

</bundles_post_ra>
